<compile_context>
chip_gen: v7x
topology: tpu7x:2x2x1
jax: 0.10.0
libtpu: 0.0.40
codegen_flags: <defaults>
</compile_context>

<pallas_src>
import functools

import jax
import jax.numpy as jnp
import numpy as np
from jax import lax
from jax.experimental import pallas as pl
from jax.experimental.pallas import tpu as pltpu

KH = KW = 5      # conv kernel size
POOL = 2         # max-pool window / stride
C_OUT = 6


def c1_kernel(xs_ref, a_ref, b_ref, o_ref):
    """One block of B images per grid step (batch concatenated along lanes).

    xs_ref: (6*H, B*Wh)   VMEM  column parity/shift slabs:
                                [t*H + h, b*Wh + pw] = x[b, h, 2*pw + t]
    a_ref:  (176, 5*H)    VMEM  fused even/odd-row conv band matrix
    b_ref:  (88, 1)       VMEM  per-row conv bias (bias[c] repeated PH times, zero pad)
    o_ref:  (88, B*Wh)    VMEM  pooled output, row c*PH + ph, lane b*Wh + pw
    """
    h = xs_ref.shape[0] // (KW + 1)          # image height H
    kwh = KW * h

    xs = xs_ref[...]
    a = a_ref[...]

    # Even pooled columns (q = 0) and odd pooled columns (q = 1): two MXU matmuls.
    y0 = jnp.dot(a, xs[:kwh], preferred_element_type=jnp.float32)        # (176, B*Wh)
    y1 = jnp.dot(a, xs[h:h + kwh], preferred_element_type=jnp.float32)   # (176, B*Wh)

    # 2x2 max-pool = max over {even,odd} conv rows (the two A halves) x {even,odd}
    # columns (q).  The 88-row split is sublane aligned.
    r = a.shape[0] // 2                                                   # 88
    z = jnp.maximum(jnp.maximum(y0[:r], y0[r:]),
                    jnp.maximum(y1[:r], y1[r:]))                          # (88, B*Wh)

    # Bias is constant over each pool window and ReLU is monotone, so both commute
    # with the maxima above.
    o_ref[...] = jnp.maximum(z + b_ref[...], 0.0)


@functools.lru_cache(maxsize=None)
def _row_placement(H):
    """Weight-independent 0/1 placement tensor P[p, ph, h, kh] = (h == 2*ph + p + kh)."""
    PH = (H - KH + 1) // POOL
    P = np.zeros((POOL, PH, H, KH), np.float32)
    for p in range(POOL):
        for ph in range(PH):
            for kh in range(KH):
                P[p, ph, POOL * ph + p + kh, kh] = 1.0
    return P


def _build_operands(weight, bias, H):
    """Fold the 5x5 conv weights into the fused band matrix A and bias rows (tiny einsum)."""
    PH = (H - KH + 1) // POOL
    R = C_OUT * PH
    R_pad = pl.cdiv(R, 8) * 8                                  # 84 -> 88 (aligned half split)

    w = weight.reshape(C_OUT, KH, KW).astype(jnp.float32)
    P = jnp.asarray(_row_placement(H))                         # (2, PH, H, KH)

    # A[p, c, ph, kw, h] = w[c, h - 2*ph - p, kw] on the band, 0 elsewhere.
    a = jnp.einsum('pqhk,ckw->pcqwh', P, w)                    # (2, C_OUT, PH, KW, H)
    a = a.reshape(POOL, R, KW * H)
    a = jnp.pad(a, ((0, 0), (0, R_pad - R), (0, 0)))
    a = a.reshape(POOL * R_pad, KW * H)                        # (176, 160) fused even/odd

    b = jnp.repeat(bias.astype(jnp.float32), PH)
    b = jnp.pad(b, (0, R_pad - R)).reshape(R_pad, 1)           # (88, 1)
    return a, b


def c1_forward(img, weight, bias, *, block_n=64):
    """img: (N, 1, H, W) f32, weight: (6, 1, 5, 5), bias: (6,) -> (N, 6, PH, PW)."""
    N, c_in, H, W = img.shape
    assert c_in == 1
    assert H >= KH and W >= KW and W % POOL == 0
    OH, OW = H - KH + 1, W - KW + 1
    PH, PW = OH // POOL, OW // POOL
    Wh = W // POOL                        # lanes per image (PW valid + padding)
    R = C_OUT * PH
    R_pad = pl.cdiv(R, 8) * 8
    T = KW + 1                            # number of column parity/shift slabs

    # Block choice: B*Wh lanes per step (64*16 = 1024 -> lane dense, unmasked stores);
    # keep >= 2 grid steps for large N so v7x's two TensorCores both get work.
    if N <= block_n:
        B, n_pad = N, N                   # single step; blocks == full arrays (always legal)
    else:
        B = block_n
        n_pad = pl.cdiv(N, B) * B

    x = img[:, 0].astype(jnp.float32)                          # (N, H, W)
    if n_pad != N:
        x = jnp.pad(x, ((0, n_pad - N), (0, 0), (0, 0)))

    # Column parity/shift slabs (plain XLA ops, once per call): slab t holds
    # x[b, h, 2*pw + t], zero padded to Wh columns.
    slabs = []
    for t in range(T):
        g = x[:, :, t::POOL]
        g = jnp.pad(g, ((0, 0), (0, 0), (0, Wh - g.shape[-1])))
        slabs.append(g)
    xs = jnp.stack(slabs, axis=0)                              # (T, n_pad, H, Wh)
    xs = xs.transpose(0, 2, 1, 3).reshape(T * H, n_pad * Wh)   # batch along lanes

    a_mat, b_rows = _build_operands(weight, bias, H)

    L = B * Wh
    out_flat = pl.pallas_call(
        c1_kernel,
        out_shape=jax.ShapeDtypeStruct((R_pad, n_pad * Wh), jnp.float32),
        grid=(n_pad // B,),
        in_specs=[
            pl.BlockSpec((T * H, L), lambda n: (0, n)),               # image slabs
            pl.BlockSpec((POOL * R_pad, KW * H), lambda n: (0, 0)),   # fused band matrix (resident)
            pl.BlockSpec((R_pad, 1), lambda n: (0, 0)),               # bias rows (resident)
        ],
        out_specs=pl.BlockSpec((R_pad, L), lambda n: (0, n)),
        compiler_params=pltpu.CompilerParams(
            dimension_semantics=("parallel",)),
    )(xs, a_mat, b_rows)

    # (R_pad, n_pad*Wh) -> NCHW: drop pad rows / pad lanes / pad images.
    out = out_flat[:R].reshape(C_OUT, PH, n_pad, Wh)
    return out.transpose(2, 0, 1, 3)[:N, :, :, :PW]


def c1_reference(img, weight, bias):
    """Plain-JAX reference matching PyTorch Conv2d -> ReLU -> MaxPool2d."""
    y = lax.conv_general_dilated(
        img, weight, window_strides=(1, 1), padding="VALID",
        dimension_numbers=("NCHW", "OIHW", "NCHW"))
    y = y + bias[None, :, None, None]
    y = jnp.maximum(y, 0.0)
    return lax.reduce_window(y, -jnp.inf, lax.max,
                             (1, 1, POOL, POOL), (1, 1, POOL, POOL), "VALID")


if __name__ == "__main__":
    key = jax.random.PRNGKey(0)
    k_img, k_w, k_b = jax.random.split(key, 3)

    N, H, W = 2, 32, 32                     # classic LeNet input size, small batch
    img = jax.random.normal(k_img, (N, 1, H, W), dtype=jnp.float32)

    # Deterministic PyTorch-style Conv2d init: U(-1/sqrt(fan_in), 1/sqrt(fan_in)), fan_in = 25.
    bound = 1.0 / (KH * KW) ** 0.5
    weight = jax.random.uniform(k_w, (C_OUT, 1, KH, KW), jnp.float32, -bound, bound)
    bias = jax.random.uniform(k_b, (C_OUT,), jnp.float32, -bound, bound)

    out = jax.jit(c1_forward)(img, weight, bias)
    out = jax.block_until_ready(out)

    ref = c1_reference(img, weight, bias)
    PH, PW = (H - KH + 1) // POOL, (W - KW + 1) // POOL
    assert out.shape == (N, C_OUT, PH, PW), out.shape
    assert jnp.allclose(out, ref, atol=2e-4, rtol=2e-4), float(jnp.max(jnp.abs(out - ref)))

    print("KERNEL_OK")
</pallas_src>

<mosaic_0001>
module attributes {stable_mosaic.version = 11 : i64} {
  func.func @c1_kernel(%arg0: i32, %arg1: memref<192x32xf32, #tpu.memory_space<vmem>>, %arg2: memref<176x160xf32, #tpu.memory_space<vmem>>, %arg3: memref<88x1xf32, #tpu.memory_space<vmem>>, %arg4: memref<88x32xf32, #tpu.memory_space<vmem>>) attributes {dimension_semantics = [#tpu.dimension_semantics<parallel>], iteration_bounds = array<i64: 1>, scalar_prefetch = 0 : i64, scratch_operands = 0 : i64, tpu.core_type = #tpu.core_type<tc>, window_params = [{transform_indices = @transform_0, window_bounds = array<i64: 192, 32>}, {pipeline_mode = #tpu.pipeline_mode<synchronous>, transform_indices = @transform_1, window_bounds = array<i64: 176, 160>}, {pipeline_mode = #tpu.pipeline_mode<synchronous>, transform_indices = @transform_2, window_bounds = array<i64: 88, 1>}, {transform_indices = @transform_3, window_bounds = array<i64: 88, 32>}]} {
    %c0 = arith.constant 0 : index
    %c0_0 = arith.constant 0 : index
    %0 = vector.load %arg1[%c0, %c0_0] : memref<192x32xf32, #tpu.memory_space<vmem>>, vector<192x32xf32>
    %c0_1 = arith.constant 0 : index
    %c0_2 = arith.constant 0 : index
    %1 = vector.load %arg2[%c0_1, %c0_2] : memref<176x160xf32, #tpu.memory_space<vmem>>, vector<176x160xf32>
    %2 = vector.extract_strided_slice %0 {offsets = [0, 0], sizes = [160, 32], strides = [1, 1]} : vector<192x32xf32> to vector<160x32xf32>
    %cst = arith.constant dense<0.000000e+00> : vector<176x32xf32>
    %3 = tpu.matmul %1, %2, %cst {dimension_numbers = #tpu.dot_dimension_numbers<[1], [0], [0], [1], [0, 0, 1, 1], [], []>} : vector<176x160xf32>, vector<160x32xf32>, vector<176x32xf32> -> vector<176x32xf32>
    %4 = vector.extract_strided_slice %0 {offsets = [32, 0], sizes = [160, 32], strides = [1, 1]} : vector<192x32xf32> to vector<160x32xf32>
    %cst_3 = arith.constant dense<0.000000e+00> : vector<176x32xf32>
    %5 = tpu.matmul %1, %4, %cst_3 {dimension_numbers = #tpu.dot_dimension_numbers<[1], [0], [0], [1], [0, 0, 1, 1], [], []>} : vector<176x160xf32>, vector<160x32xf32>, vector<176x32xf32> -> vector<176x32xf32>
    %6 = vector.extract_strided_slice %3 {offsets = [0, 0], sizes = [88, 32], strides = [1, 1]} : vector<176x32xf32> to vector<88x32xf32>
    %7 = vector.extract_strided_slice %3 {offsets = [88, 0], sizes = [88, 32], strides = [1, 1]} : vector<176x32xf32> to vector<88x32xf32>
    %8 = arith.maximumf %6, %7 : vector<88x32xf32>
    %9 = vector.extract_strided_slice %5 {offsets = [0, 0], sizes = [88, 32], strides = [1, 1]} : vector<176x32xf32> to vector<88x32xf32>
    %10 = vector.extract_strided_slice %5 {offsets = [88, 0], sizes = [88, 32], strides = [1, 1]} : vector<176x32xf32> to vector<88x32xf32>
    %11 = arith.maximumf %9, %10 : vector<88x32xf32>
    %12 = arith.maximumf %8, %11 : vector<88x32xf32>
    %c0_4 = arith.constant 0 : index
    %c0_5 = arith.constant 0 : index
    %13 = vector.load %arg3[%c0_4, %c0_5] : memref<88x1xf32, #tpu.memory_space<vmem>>, vector<88x1xf32>
    %14 = vector.broadcast %13 : vector<88x1xf32> to vector<88x32xf32>
    %15 = arith.addf %12, %14 : vector<88x32xf32>
    %cst_6 = arith.constant 0.000000e+00 : f32
    %16 = vector.broadcast %cst_6 : f32 to vector<88x32xf32>
    %17 = arith.maximumf %15, %16 : vector<88x32xf32>
    %c0_7 = arith.constant 0 : index
    %c0_8 = arith.constant 0 : index
    %18 = vector.load %arg4[%c0_7, %c0_8] : memref<88x32xf32, #tpu.memory_space<vmem>>, vector<88x32xf32>
    tpu.vector_store %arg4[%c0_7, %c0_8], %17 {strides = array<i32>} : memref<88x32xf32, #tpu.memory_space<vmem>>, vector<88x32xf32>,
    return
  }
  func.func @transform_0(%arg0: i32) -> (i32, i32) {
    %c0_i32 = arith.constant 0 : i32
    %c0_i32_0 = arith.constant 0 : i32
    return %c0_i32, %arg0 : i32, i32
  }
  func.func @transform_1(%arg0: i32) -> (i32, i32) {
    %c0_i32 = arith.constant 0 : i32
    %c0_i32_0 = arith.constant 0 : i32
    %c0_i32_1 = arith.constant 0 : i32
    return %c0_i32, %c0_i32_0 : i32, i32
  }
  func.func @transform_2(%arg0: i32) -> (i32, i32) {
    %c0_i32 = arith.constant 0 : i32
    %c0_i32_0 = arith.constant 0 : i32
    %c0_i32_1 = arith.constant 0 : i32
    return %c0_i32, %c0_i32_0 : i32, i32
  }
  func.func @transform_3(%arg0: i32) -> (i32, i32) {
    %c0_i32 = arith.constant 0 : i32
    %c0_i32_0 = arith.constant 0 : i32
    return %c0_i32, %arg0 : i32, i32
  }
}

</mosaic_0001>

<bundles_post_ra>
// kernel: c1_forward.1
= control target key start
LH: loop header
LB: loop body
LE: loop exit
PB: predicated region body
PF: predicated region fallthrough
CT: control target
= control target key end

     0   :  { %v743_v0 = vmov 0.0|0.0   ;;  %v744_v8 = vmov 0   ;;  %vm82_vm0 = vcmask 261120   ;;  %s1164_s0 = inlined_call_operand.vmem [shape: f32[192,32], index: 0, kind: input, shape index: {}]   ;;  %s1165_s1 = inlined_call_operand.vmem [shape: f32[176,160], index: 1, kind: input, shape index: {}]   ;;  %s1166_s2 = inlined_call_operand.vmem [shape: f32[88,1], index: 2, kind: input, shape index: {}]   ;;  %s1167_s3 = inlined_call_operand.vmem [shape: f32[88,32], index: 3, kind: output, shape index: {}]  }
   0x1   :  { %679 = vmatprep.subr.bf16.mxu0 %v743_v0  ;;  %709 = vmatprep.subr.bf16.mxu1 %v743_v0  ;;  %v14_v1 = vld [vmem:[%s1164_s0] sm:$0xff]  ;;  %v15_v2 = vld [vmem:[%s1164_s0 + $0x8] sm:$0xff]  ;;  %v16_v6 = vld [vmem:[%s1164_s0 + $0x10] sm:$0xff] }
   0x2   :  { %v18_v3 = vld [vmem:[%s1164_s0 + $0x20] sm:$0xff]  ;;  %v680_v4 = vpack.c.bf16 %v15_v2, %v14_v1  ;;  %v19_v5 = vld [vmem:[%s1164_s0 + $0x28] sm:$0xff]  ;;  %v17_v7 = vld [vmem:[%s1164_s0 + $0x18] sm:$0xff]  ;;  %741 = vset.pattern.permute.xlu0 %v744_v8  ;;  %742 = vset.pattern.permute.xlu1 %v744_v8 }
   0x3   :  { %v686_v9 = vpack.c.bf16 %v19_v5, %v18_v3  ;;  %v20_v10 = vld [vmem:[%s1164_s0 + $0x30] sm:$0xff]  ;;  %v21_v11 = vld [vmem:[%s1164_s0 + $0x38] sm:$0xff]  ;;  %v683_v12 = vpack.c.bf16 %v17_v7, %v16_v6  ;;  %v22_v14 = vld [vmem:[%s1164_s0 + $0x40] sm:$0xff] }
   0x4   :  { %681 = vmatpush1.bf16.msra.mxu0 %v680_v4  ;;  %v689_v13 = vpack.c.bf16 %v21_v11, %v20_v10  ;;  %v23_v15 = vld [vmem:[%s1164_s0 + $0x48] sm:$0xff]  ;;  %v24_v18 = vld [vmem:[%s1164_s0 + $0x50] sm:$0xff]  ;;  %v25_v19 = vld [vmem:[%s1164_s0 + $0x58] sm:$0xff] }
   0x5   :  { %711 = vmatpush1.bf16.msra.mxu1 %v686_v9  ;;  %682 = vmatprep.subr.bf16.mxu0 %v743_v0  ;;  %v692_v16 = vpack.c.bf16 %v23_v15, %v22_v14  ;;  %v39_v17 = vld [vmem:[%s1165_s1 + $0x8] sm:$0xff]  ;;  %v695_v20 = vpack.c.bf16 %v25_v19, %v24_v18  ;;  %v26_v21 = vld [vmem:[%s1164_s0 + $0x60] sm:$0xff]  ;;  %v28_v24 = vld [vmem:[%s1164_s0 + $0x70] sm:$0xff] }
   0x6   :  { %712 = vmatprep.subr.bf16.mxu1 %v743_v0  ;;  %635 = vmatprep.mubr.msk.f32.mxu0 %vm82_vm0, %v39_v17  ;;  %v27_v22 = vld [vmem:[%s1164_s0 + $0x68] sm:$0xff]  ;;  %v29_v25 = vld [vmem:[%s1164_s0 + $0x78] sm:$0xff]  ;;  %v30_v27 = vld [vmem:[%s1164_s0 + $0x80] sm:$0xff] }
   0x7   :  { %657 = vmatprep.mubr.msk.f32.mxu1 %vm82_vm0, %v39_v17  ;;  %v698_v23 = vpack.c.bf16 %v27_v22, %v26_v21  ;;  %v701_v26 = vpack.c.bf16 %v29_v25, %v28_v24  ;;  %v31_v28 = vld [vmem:[%s1164_s0 + $0x88] sm:$0xff]  ;;  %v532_v29 = vld [vmem:[%s1166_s2] sm:$0xff]  ;;  %v534_v30 = vld [vmem:[%s1166_s2 + $0x10] sm:$0xff] }
   0x8   :  { %684 = vmatpush1.bf16.msra.mxu0 %v683_v12  ;;  %545 = vperm.xlu0 %741, %v532_v29   ;;  %v704_v31 = vpack.c.bf16 %v31_v28, %v30_v27  ;;  %v533_v32 = vld [vmem:[%s1166_s2 + $0x8] sm:$0xff]  ;;  %v32_v33 = vld [vmem:[%s1164_s0 + $0x90] sm:$0xff]  ;;  %v33_v34 = vld [vmem:[%s1164_s0 + $0x98] sm:$0xff] }
   0x9   :  { %714 = vmatpush1.bf16.msra.mxu1 %v689_v13  ;;  %685 = vmatprep.subr.bf16.mxu0 %v743_v0  ;;  %v535_v35 = vld [vmem:[%s1166_s2 + $0x18] sm:$0xff]  ;;  %v707_v36 = vpack.c.bf16 %v33_v34, %v32_v33  ;;  %v536_v37 = vld [vmem:[%s1166_s2 + $0x20] sm:$0xff]  ;;  %v35_v39 = vld [vmem:[%s1164_s0 + $0xa8] sm:$0xff] }
   0xa   :  { %715 = vmatprep.subr.bf16.mxu1 %v743_v0  ;;  %555 = vperm.xlu1 %742, %v534_v30   ;;  %v34_v38 = vld [vmem:[%s1164_s0 + $0xa0] sm:$0xff]  ;;  %v537_v40 = vld [vmem:[%s1166_s2 + $0x28] sm:$0xff]  ;;  %v538_v42 = vld [vmem:[%s1166_s2 + $0x30] sm:$0xff] }
   0xb   :  { %v734_v41 = vpack.c.bf16 %v35_v39, %v34_v38  ;;  %v36_v43 = vld [vmem:[%s1164_s0 + $0xb0] sm:$0xff]  ;;  %v37_v44 = vld [vmem:[%s1164_s0 + $0xb8] sm:$0xff]  ;;  %v540_v47 = vld [vmem:[%s1166_s2 + $0x40] sm:$0xff] }
   0xc   :  { %687 = vmatpush1.bf16.msra.mxu0 %v686_v9  ;;  %550 = vperm.xlu0 %741, %v533_v32   ;;  %v539_v45 = vld [vmem:[%s1166_s2 + $0x38] sm:$0xff]  ;;  %v737_v46 = vpack.c.bf16 %v37_v44, %v36_v43  ;;  %v541_v48 = vld [vmem:[%s1166_s2 + $0x48] sm:$0xff]  ;;  %v38_v49 = vld [vmem:[%s1165_s1] sm:$0xff] }
   0xd   :  { %717 = vmatpush1.bf16.msra.mxu1 %v692_v16  ;;  %688 = vmatprep.subr.bf16.mxu0 %v743_v0  ;;  %v41_v50 = vld [vmem:[%s1165_s1 + $0x18] sm:$0xff]  ;;  %v542_v51 = vld [vmem:[%s1166_s2 + $0x50] sm:$0xff]  ;;  %v43_v53 = vld [vmem:[%s1165_s1 + $0x28] sm:$0xff] }
   0xe   :  { %718 = vmatprep.subr.bf16.mxu1 %v743_v0  ;;  %560 = vperm.xlu1 %742, %v535_v35   ;;  %v40_v52 = vld [vmem:[%s1165_s1 + $0x10] sm:$0xff]  ;;  %v42_v54 = vld [vmem:[%s1165_s1 + $0x20] sm:$0xff]  ;;  %v45_v55 = vld [vmem:[%s1165_s1 + $0x38] sm:$0xff] }
   0xf   :  { %v44_v56 = vld [vmem:[%s1165_s1 + $0x30] sm:$0xff]  ;;  %v47_v57 = vld [vmem:[%s1165_s1 + $0x48] sm:$0xff]  ;;  %v46_v58 = vld [vmem:[%s1165_s1 + $0x40] sm:$0xff] }
  0x10   :  { %690 = vmatpush1.bf16.msra.mxu0 %v689_v13  ;;  %565 = vperm.xlu0 %741, %v536_v37   ;;  %v49_v59 = vld [vmem:[%s1165_s1 + $0x58] sm:$0xff]  ;;  %v48_v60 = vld [vmem:[%s1165_s1 + $0x50] sm:$0xff]  ;;  %v51_v61 = vld [vmem:[%s1165_s1 + $0x68] sm:$0xff] }
  0x11   :  { %720 = vmatpush1.bf16.msra.mxu1 %v695_v20  ;;  %691 = vmatprep.subr.bf16.mxu0 %v743_v0  ;;  %v50_v62 = vld [vmem:[%s1165_s1 + $0x60] sm:$0xff]  ;;  %v53_v63 = vld [vmem:[%s1165_s1 + $0x78] sm:$0xff]  ;;  %v55_v1 = vld [vmem:[%s1165_s1 + $0x88] sm:$0xff] }
  0x12   :  { %721 = vmatprep.subr.bf16.mxu1 %v743_v0  ;;  %570 = vperm.xlu1 %742, %v537_v40   ;;  %v54_v2 = vld [vmem:[%s1165_s1 + $0x80] sm:$0xff]  ;;  %v57_v3 = vld [vmem:[%s1165_s1 + $0x98] sm:$0xff]  ;;  %v56_v4 = vld [vmem:[%s1165_s1 + $0x90] sm:$0xff] }
  0x13   :  { %v59_v5 = vld [vmem:[%s1165_s1 + $0xa8] sm:$0xff]  ;;  %v58_v6 = vld [vmem:[%s1165_s1 + $0xa0] sm:$0xff]  ;;  %v61_v7 = vld [vmem:[%s1165_s1 + $0xb8] sm:$0xff] }
  0x14   :  { %693 = vmatpush1.bf16.msra.mxu0 %v692_v16  ;;  %575 = vperm.xlu0 %741, %v538_v42   ;;  %v60_v8 = vld [vmem:[%s1165_s1 + $0xb0] sm:$0xff]  ;;  %v63_v9 = vld [vmem:[%s1165_s1 + $0xc8] sm:$0xff]  ;;  %v62_v10 = vld [vmem:[%s1165_s1 + $0xc0] sm:$0xff] }
  0x15   :  { %723 = vmatpush1.bf16.msra.mxu1 %v698_v23  ;;  %694 = vmatprep.subr.bf16.mxu0 %v743_v0  ;;  %v65_v11 = vld [vmem:[%s1165_s1 + $0xd8] sm:$0xff]  ;;  %v64_v12 = vld [vmem:[%s1165_s1 + $0xd0] sm:$0xff]  ;;  %v67_v13 = vld [vmem:[%s1165_s1 + $0xe8] sm:$0xff] }
  0x16   :  { %724 = vmatprep.subr.bf16.mxu1 %v743_v0  ;;  %580 = vperm.xlu1 %742, %v539_v45   ;;  %v66_v14 = vld [vmem:[%s1165_s1 + $0xe0] sm:$0xff]  ;;  %v69_v15 = vld [vmem:[%s1165_s1 + $0xf8] sm:$0xff]  ;;  %v68_v16 = vld [vmem:[%s1165_s1 + $0xf0] sm:$0xff] }
  0x17   :  { %v71_v17 = vld [vmem:[%s1165_s1 + $0x108] sm:$0xff]  ;;  %v70_v18 = vld [vmem:[%s1165_s1 + $0x100] sm:$0xff]  ;;  %v73_v19 = vld [vmem:[%s1165_s1 + $0x118] sm:$0xff] }
  0x18   :  { %696 = vmatpush1.bf16.msra.mxu0 %v695_v20  ;;  %585 = vperm.xlu0 %741, %v540_v47   ;;  %v72_v20 = vld [vmem:[%s1165_s1 + $0x110] sm:$0xff]  ;;  %v75_v21 = vld [vmem:[%s1165_s1 + $0x128] sm:$0xff]  ;;  %v74_v22 = vld [vmem:[%s1165_s1 + $0x120] sm:$0xff] }
  0x19   :  { %726 = vmatpush1.bf16.msra.mxu1 %v701_v26  ;;  %697 = vmatprep.subr.bf16.mxu0 %v743_v0  ;;  %v76_v24 = vld [vmem:[%s1165_s1 + $0x130] sm:$0xff]  ;;  %v79_v25 = vld [vmem:[%s1165_s1 + $0x148] sm:$0xff]  ;;  %v81_v27 = vld [vmem:[%s1165_s1 + $0x158] sm:$0xff] }
  0x1a   :  { %727 = vmatprep.subr.bf16.mxu1 %v743_v0  ;;  %590 = vperm.xlu1 %742, %v541_v48   ;;  %v80_v28 = vld [vmem:[%s1165_s1 + $0x150] sm:$0xff] }
  0x1c   :  { %699 = vmatpush1.bf16.msra.mxu0 %v698_v23  ;;  %595 = vperm.xlu0 %741, %v542_v51   ;;  %v77_v23 = vld [vmem:[%s1165_s1 + $0x138] sm:$0xff] }
  0x1d   :  { %729 = vmatpush1.bf16.msra.mxu1 %v704_v31  ;;  %700 = vmatprep.subr.bf16.mxu0 %v743_v0 }
  0x1e   :  { %730 = vmatprep.subr.bf16.mxu1 %v743_v0 }
  0x20   :  { %702 = vmatpush1.bf16.msra.mxu0 %v701_v26  ;;  %v78_v26 = vld [vmem:[%s1165_s1 + $0x140] sm:$0xff] }
  0x21   :  { %732 = vmatpush1.bf16.msra.mxu1 %v707_v36  ;;  %703 = vmatprep.subr.bf16.mxu0 %v743_v0 }
  0x22   :  { %733 = vmatprep.subr.bf16.mxu1 %v743_v0 }
  0x24   :  { %705 = vmatpush1.bf16.msra.mxu0 %v704_v31 }
  0x25   :  { %735 = vmatpush1.bf16.msra.mxu1 %v734_v41  ;;  %706 = vmatprep.subr.bf16.mxu0 %v743_v0 }
  0x26   :  { %736 = vmatprep.subr.bf16.mxu1 %v743_v0  ;;  %v52_v0 = vld [vmem:[%s1165_s1 + $0x70] sm:$0xff] }
  0x28   :  { %708 = vmatpush1.bf16.msra.mxu0 %v707_v36 }
  0x29   :  { %738 = vmatpush1.bf16.msra.mxu1 %v737_v46 }
  0x2b   :  { %214 = vmatmul.mubr.f32.vlgmr.msra.gmra.mrb[0].mxu0 %v38_v49 }
  0x2c   :  { %389 = vmatmul.mubr.f32.vlgmr.msra.gmra.mrb[0].mxu1 %v38_v49  ;;  %636 = vmatprep.mubr.msk.f32.mxu0 %vm82_vm0, %v41_v50 }
  0x2d   :  { %658 = vmatprep.mubr.msk.f32.mxu1 %vm82_vm0, %v41_v50 }
  0x2f   :  { %219 = vmatmul.mubr.f32.gmra.mrb[2].mxu0 %v40_v52 }
  0x30   :  { %394 = vmatmul.mubr.f32.gmra.mrb[2].mxu1 %v40_v52  ;;  %637 = vmatprep.mubr.msk.f32.mxu0 %vm82_vm0, %v43_v53 }
  0x31   :  { %659 = vmatprep.mubr.msk.f32.mxu1 %vm82_vm0, %v43_v53 }
  0x33   :  { %224 = vmatmul.mubr.f32.gmra.mrb[4].mxu0 %v42_v54 }
  0x34   :  { %399 = vmatmul.mubr.f32.gmra.mrb[4].mxu1 %v42_v54  ;;  %638 = vmatprep.mubr.msk.f32.mxu0 %vm82_vm0, %v45_v55 }
  0x35   :  { %660 = vmatprep.mubr.msk.f32.mxu1 %vm82_vm0, %v45_v55 }
  0x37   :  { %229 = vmatmul.mubr.f32.gmra.mrb[6].mxu0 %v44_v56 }
  0x38   :  { %404 = vmatmul.mubr.f32.gmra.mrb[6].mxu1 %v44_v56  ;;  %639 = vmatprep.mubr.msk.f32.mxu0 %vm82_vm0, %v47_v57 }
  0x39   :  { %661 = vmatprep.mubr.msk.f32.mxu1 %vm82_vm0, %v47_v57 }
  0x3b   :  { %234 = vmatmul.mubr.f32.gmra.mrb[8].mxu0 %v46_v58 }
  0x3c   :  { %409 = vmatmul.mubr.f32.gmra.mrb[8].mxu1 %v46_v58  ;;  %640 = vmatprep.mubr.msk.f32.mxu0 %vm82_vm0, %v49_v59 }
  0x3d   :  { %662 = vmatprep.mubr.msk.f32.mxu1 %vm82_vm0, %v49_v59 }
  0x3f   :  { %239 = vmatmul.mubr.f32.gmra.mrb[10].mxu0 %v48_v60 }
  0x40   :  { %414 = vmatmul.mubr.f32.gmra.mrb[10].mxu1 %v48_v60  ;;  %641 = vmatprep.mubr.msk.f32.mxu0 %vm82_vm0, %v51_v61 }
  0x41   :  { %663 = vmatprep.mubr.msk.f32.mxu1 %vm82_vm0, %v51_v61 }
  0x43   :  { %244 = vmatmul.mubr.f32.gmra.mrb[12].mxu0 %v50_v62 }
  0x44   :  { %419 = vmatmul.mubr.f32.gmra.mrb[12].mxu1 %v50_v62  ;;  %642 = vmatprep.mubr.msk.f32.mxu0 %vm82_vm0, %v53_v63 }
  0x45   :  { %664 = vmatprep.mubr.msk.f32.mxu1 %vm82_vm0, %v53_v63 }
  0x47   :  { %249 = vmatmul.mubr.f32.gmra.mrb[14].mxu0 %v52_v0 }
  0x48   :  { %424 = vmatmul.mubr.f32.gmra.mrb[14].mxu1 %v52_v0  ;;  %643 = vmatprep.mubr.msk.f32.mxu0 %vm82_vm0, %v55_v1 }
  0x49   :  { %665 = vmatprep.mubr.msk.f32.mxu1 %vm82_vm0, %v55_v1 }
  0x4b   :  { %254 = vmatmul.mubr.f32.gmra.mrb[16].mxu0 %v54_v2 }
  0x4c   :  { %429 = vmatmul.mubr.f32.gmra.mrb[16].mxu1 %v54_v2  ;;  %644 = vmatprep.mubr.msk.f32.mxu0 %vm82_vm0, %v57_v3 }
  0x4d   :  { %666 = vmatprep.mubr.msk.f32.mxu1 %vm82_vm0, %v57_v3 }
  0x4f   :  { %259 = vmatmul.mubr.f32.gmra.mrb[18].mxu0 %v56_v4 }
  0x50   :  { %434 = vmatmul.mubr.f32.gmra.mrb[18].mxu1 %v56_v4  ;;  %645 = vmatprep.mubr.msk.f32.mxu0 %vm82_vm0, %v59_v5 }
  0x51   :  { %667 = vmatprep.mubr.msk.f32.mxu1 %vm82_vm0, %v59_v5 }
  0x53   :  { %264 = vmatmul.mubr.f32.gmra.mrb[20].mxu0 %v58_v6 }
  0x54   :  { %439 = vmatmul.mubr.f32.gmra.mrb[20].mxu1 %v58_v6  ;;  %646 = vmatprep.mubr.msk.f32.mxu0 %vm82_vm0, %v61_v7 }
  0x55   :  { %668 = vmatprep.mubr.msk.f32.mxu1 %vm82_vm0, %v61_v7 }
  0x57   :  { %269 = vmatmul.mubr.f32.gmra.mrb[22].mxu0 %v60_v8 }
  0x58   :  { %444 = vmatmul.mubr.f32.gmra.mrb[22].mxu1 %v60_v8  ;;  %647 = vmatprep.mubr.msk.f32.mxu0 %vm82_vm0, %v63_v9 }
  0x59   :  { %669 = vmatprep.mubr.msk.f32.mxu1 %vm82_vm0, %v63_v9 }
  0x5b   :  { %274 = vmatmul.mubr.f32.gmra.mrb[24].mxu0 %v62_v10 }
  0x5c   :  { %449 = vmatmul.mubr.f32.gmra.mrb[24].mxu1 %v62_v10  ;;  %648 = vmatprep.mubr.msk.f32.mxu0 %vm82_vm0, %v65_v11 }
  0x5d   :  { %670 = vmatprep.mubr.msk.f32.mxu1 %vm82_vm0, %v65_v11 }
  0x5f   :  { %279 = vmatmul.mubr.f32.gmra.mrb[26].mxu0 %v64_v12 }
  0x60   :  { %454 = vmatmul.mubr.f32.gmra.mrb[26].mxu1 %v64_v12  ;;  %649 = vmatprep.mubr.msk.f32.mxu0 %vm82_vm0, %v67_v13 }
  0x61   :  { %671 = vmatprep.mubr.msk.f32.mxu1 %vm82_vm0, %v67_v13 }
  0x63   :  { %284 = vmatmul.mubr.f32.gmra.mrb[28].mxu0 %v66_v14 }
  0x64   :  { %459 = vmatmul.mubr.f32.gmra.mrb[28].mxu1 %v66_v14  ;;  %650 = vmatprep.mubr.msk.f32.mxu0 %vm82_vm0, %v69_v15 }
  0x65   :  { %672 = vmatprep.mubr.msk.f32.mxu1 %vm82_vm0, %v69_v15 }
  0x67   :  { %289 = vmatmul.mubr.f32.gmra.mrb[30].mxu0 %v68_v16 }
  0x68   :  { %464 = vmatmul.mubr.f32.gmra.mrb[30].mxu1 %v68_v16  ;;  %651 = vmatprep.mubr.msk.f32.mxu0 %vm82_vm0, %v71_v17 }
  0x69   :  { %673 = vmatprep.mubr.msk.f32.mxu1 %vm82_vm0, %v71_v17 }
  0x6b   :  { %294 = vmatmul.mubr.f32.gmra.mrb[32].mxu0 %v70_v18 }
  0x6c   :  { %469 = vmatmul.mubr.f32.gmra.mrb[32].mxu1 %v70_v18  ;;  %652 = vmatprep.mubr.msk.f32.mxu0 %vm82_vm0, %v73_v19 }
  0x6d   :  { %674 = vmatprep.mubr.msk.f32.mxu1 %vm82_vm0, %v73_v19 }
  0x6f   :  { %299 = vmatmul.mubr.f32.gmra.mrb[34].mxu0 %v72_v20 }
  0x70   :  { %474 = vmatmul.mubr.f32.gmra.mrb[34].mxu1 %v72_v20  ;;  %653 = vmatprep.mubr.msk.f32.mxu0 %vm82_vm0, %v75_v21 }
  0x71   :  { %675 = vmatprep.mubr.msk.f32.mxu1 %vm82_vm0, %v75_v21 }
  0x73   :  { %304 = vmatmul.mubr.f32.gmra.mrb[36].mxu0 %v74_v22 }
  0x74   :  { %479 = vmatmul.mubr.f32.gmra.mrb[36].mxu1 %v74_v22  ;;  %654 = vmatprep.mubr.msk.f32.mxu0 %vm82_vm0, %v77_v23 }
  0x75   :  { %676 = vmatprep.mubr.msk.f32.mxu1 %vm82_vm0, %v77_v23 }
  0x77   :  { %309 = vmatmul.mubr.f32.gmra.mrb[38].mxu0 %v76_v24 }
  0x78   :  { %484 = vmatmul.mubr.f32.gmra.mrb[38].mxu1 %v76_v24  ;;  %655 = vmatprep.mubr.msk.f32.mxu0 %vm82_vm0, %v79_v25 }
  0x79   :  { %677 = vmatprep.mubr.msk.f32.mxu1 %vm82_vm0, %v79_v25 }
  0x7b   :  { %314 = vmatmul.mubr.f32.gmra.mrb[40].mxu0 %v78_v26 }
  0x7c   :  { %489 = vmatmul.mubr.f32.gmra.mrb[40].mxu1 %v78_v26  ;;  %656 = vmatprep.mubr.msk.f32.mxu0 %vm82_vm0, %v81_v27 }
  0x7d   :  { %678 = vmatprep.mubr.msk.f32.mxu1 %vm82_vm0, %v81_v27 }
  0x7f   :  { %319 = vmatmul.mubr.f32.gmra.mrb[42].mxu0 %v80_v28 }
  0x80   :  { %494 = vmatmul.mubr.f32.gmra.mrb[42].mxu1 %v80_v28 }
  0x87   :  { %v546_v10 = vpop.permute.xlu0 %545 }
  0x89   :  { %v556_v28 = vpop.permute.xlu1 %555 }
  0x8b   :  { %v551_v24 = vpop.permute.xlu0 %550 }
  0xfe   :  { %v215_v29 = vpop.f32.mrb[0].mxu0 }
  0xff   :  { %v390_v30 = vpop.f32.mrb[0].mxu1  ;;  %v217_v31 = vpop.f32.mrb[1].mxu0 }
 0x100   :  { %v392_v32 = vpop.f32.mrb[1].mxu1 }
 0x102   :  { %v220_v33 = vpop.f32.mrb[2].mxu0 }
 0x103   :  { %v395_v34 = vpop.f32.mrb[2].mxu1  ;;  %v222_v35 = vpop.f32.mrb[3].mxu0 }
 0x104   :  { %v397_v36 = vpop.f32.mrb[3].mxu1 }
 0x106   :  { %v1066_v37 = vpop.f32.mrb[4].mxu0 }
 0x107   :  { %v1068_v38 = vpop.f32.mrb[4].mxu1  ;;  %v227_v39 = vpop.f32.mrb[5].mxu0 }
 0x108   :  { %v402_v40 = vpop.f32.mrb[5].mxu1 }
 0x10a   :  { %v1070_v41 = vpop.f32.mrb[6].mxu0 }
 0x10b   :  { %v1072_v42 = vpop.f32.mrb[6].mxu1  ;;  %v232_v43 = vpop.f32.mrb[7].mxu0 }
 0x10c   :  { %v407_v44 = vpop.f32.mrb[7].mxu1 }
 0x10e   :  { %v1074_v45 = vpop.f32.mrb[8].mxu0 }
 0x10f   :  { %v1076_v46 = vpop.f32.mrb[8].mxu1  ;;  %v237_v47 = vpop.f32.mrb[9].mxu0 }
 0x110   :  { %v412_v48 = vpop.f32.mrb[9].mxu1 }
 0x112   :  { %v1078_v49 = vpop.f32.mrb[10].mxu0 }
 0x113   :  { %v1080_v50 = vpop.f32.mrb[10].mxu1  ;;  %v242_v51 = vpop.f32.mrb[11].mxu0 }
 0x114   :  { %v417_v52 = vpop.f32.mrb[11].mxu1  ;;  %v561_v51 = vpop.permute.xlu1 %560 }
 0x116   :  { %v1082_v53 = vpop.f32.mrb[12].mxu0 }
 0x117   :  { %v1084_v54 = vpop.f32.mrb[12].mxu1  ;;  %v247_v55 = vpop.f32.mrb[13].mxu0 }
 0x118   :  { %v422_v56 = vpop.f32.mrb[13].mxu1 }
 0x11a   :  { %v1086_v57 = vpop.f32.mrb[14].mxu0 }
 0x11b   :  { %v1088_v58 = vpop.f32.mrb[14].mxu1  ;;  %v252_v59 = vpop.f32.mrb[15].mxu0 }
 0x11c   :  { %v427_v60 = vpop.f32.mrb[15].mxu1 }
 0x11e   :  { %v1090_v61 = vpop.f32.mrb[16].mxu0 }
 0x11f   :  { %v1092_v62 = vpop.f32.mrb[16].mxu1  ;;  %v257_v63 = vpop.f32.mrb[17].mxu0 }
 0x120   :  { %v432_v0 = vpop.f32.mrb[17].mxu1 }
 0x122   :  { %v1094_v1 = vpop.f32.mrb[18].mxu0 }
 0x123   :  { %v1096_v2 = vpop.f32.mrb[18].mxu1  ;;  %v262_v3 = vpop.f32.mrb[19].mxu0 }
 0x124   :  { %v437_v4 = vpop.f32.mrb[19].mxu1  ;;  %v566_v3 = vpop.permute.xlu0 %565 }
 0x126   :  { %v1098_v5 = vpop.f32.mrb[20].mxu0 }
 0x127   :  { %v1100_v6 = vpop.f32.mrb[20].mxu1  ;;  %v267_v7 = vpop.f32.mrb[21].mxu0 }
 0x128   :  { %v442_v8 = vpop.f32.mrb[21].mxu1 }
 0x12a   :  { %v270_v9 = vpop.f32.mrb[22].mxu0 }
 0x12b   :  { %v499_v11 = vmax.f32 %v215_v29, %v270_v9  ;;  %v445_v12 = vpop.f32.mrb[22].mxu1  ;;  %v272_v13 = vpop.f32.mrb[23].mxu0 }
 0x12c   :  { %v510_v14 = vmax.f32 %v390_v30, %v445_v12  ;;  %v447_v15 = vpop.f32.mrb[23].mxu1 }
 0x12e   :  { %v521_v16 = vmax.f32 %v499_v11, %v510_v14  ;;  %v275_v17 = vpop.f32.mrb[24].mxu0 }
 0x12f   :  { %v500_v18 = vmax.f32 %v220_v33, %v275_v17  ;;  %v450_v19 = vpop.f32.mrb[24].mxu1  ;;  %v277_v20 = vpop.f32.mrb[25].mxu0 }
 0x130   :  { %v598_v21 = vadd.f32 %v546_v10, %v521_v16  ;;  %v511_v22 = vmax.f32 %v395_v34, %v450_v19  ;;  %v452_v23 = vpop.f32.mrb[25].mxu1 }
 0x132   :  { %v609_v25 = vmax.f32 %v598_v21, 0.0  ;;  %v522_v26 = vmax.f32 %v500_v18, %v511_v22  ;;  %v280_v27 = vpop.f32.mrb[26].mxu0  ;;  %v576_v21 = vpop.permute.xlu0 %575 }
 0x133   :  { %v501_v31 = vmax.f32 %v1066_v37, %v280_v27  ;;  %v455_v29 = vpop.f32.mrb[26].mxu1  ;;  %v282_v32 = vpop.f32.mrb[27].mxu0 }
 0x134   :  { %620 = vst.msk [vmem:[%s1167_s3] sm:$0xff] %vm82_vm0, %v609_v25  ;;  %v599_v30 = vadd.f32 %v551_v24, %v522_v26  ;;  %v512_v33 = vmax.f32 %v1068_v38, %v455_v29  ;;  %v457_v35 = vpop.f32.mrb[27].mxu1 }
 0x136   :  { %v610_v34 = vmax.f32 %v599_v30, 0.0  ;;  %v523_v36 = vmax.f32 %v501_v31, %v512_v33  ;;  %v285_v39 = vpop.f32.mrb[28].mxu0 }
 0x137   :  { %v502_v40 = vmax.f32 %v1070_v41, %v285_v39  ;;  %v460_v43 = vpop.f32.mrb[28].mxu1  ;;  %v287_v44 = vpop.f32.mrb[29].mxu0 }
 0x138   :  { %621 = vst.msk [vmem:[%s1167_s3 + $0x8] sm:$0xff] %vm82_vm0, %v610_v34  ;;  %v600_v37 = vadd.f32 %v556_v28, %v523_v36  ;;  %v513_v47 = vmax.f32 %v1072_v42, %v460_v43  ;;  %v462_v48 = vpop.f32.mrb[29].mxu1  ;;  %v586_v39 = vpop.permute.xlu0 %585 }
 0x13a   :  { %v611_v52 = vmax.f32 %v600_v37, 0.0  ;;  %v524_v38 = vmax.f32 %v502_v40, %v513_v47  ;;  %v290_v55 = vpop.f32.mrb[30].mxu0 }
 0x13b   :  { %v503_v56 = vmax.f32 %v1074_v45, %v290_v55  ;;  %v465_v59 = vpop.f32.mrb[30].mxu1  ;;  %v292_v60 = vpop.f32.mrb[31].mxu0 }
 0x13c   :  { %622 = vst.msk [vmem:[%s1167_s3 + $0x10] sm:$0xff] %vm82_vm0, %v611_v52  ;;  %v601_v41 = vadd.f32 %v561_v51, %v524_v38  ;;  %v514_v63 = vmax.f32 %v1076_v46, %v465_v59  ;;  %v467_v0 = vpop.f32.mrb[31].mxu1  ;;  %v571_v46 = vpop.permute.xlu1 %570 }
 0x13e   :  { %v612_v42 = vmax.f32 %v601_v41, 0.0  ;;  %v525_v4 = vmax.f32 %v503_v56, %v514_v63  ;;  %v295_v7 = vpop.f32.mrb[32].mxu0 }
 0x13f   :  { %v504_v8 = vmax.f32 %v1078_v49, %v295_v7  ;;  %v470_v9 = vpop.f32.mrb[32].mxu1  ;;  %v297_v10 = vpop.f32.mrb[33].mxu0 }
 0x140   :  { %623 = vst.msk [vmem:[%s1167_s3 + $0x18] sm:$0xff] %vm82_vm0, %v612_v42  ;;  %v602_v45 = vadd.f32 %v566_v3, %v525_v4  ;;  %v515_v11 = vmax.f32 %v1080_v50, %v470_v9  ;;  %v472_v12 = vpop.f32.mrb[33].mxu1  ;;  %v581_v31 = vpop.permute.xlu1 %580 }
 0x141   :  { %v596_v3 = vpop.permute.xlu0 %595 }
 0x142   :  { %v613_v13 = vmax.f32 %v602_v45, 0.0  ;;  %v526_v14 = vmax.f32 %v504_v8, %v515_v11  ;;  %v300_v15 = vpop.f32.mrb[34].mxu0 }
 0x143   :  { %v505_v16 = vmax.f32 %v1082_v53, %v300_v15  ;;  %v475_v17 = vpop.f32.mrb[34].mxu1  ;;  %v302_v18 = vpop.f32.mrb[35].mxu0 }
 0x144   :  { %624 = vst.msk [vmem:[%s1167_s3 + $0x20] sm:$0xff] %vm82_vm0, %v613_v13  ;;  %v603_v49 = vadd.f32 %v571_v46, %v526_v14  ;;  %v516_v19 = vmax.f32 %v1084_v54, %v475_v17  ;;  %v477_v20 = vpop.f32.mrb[35].mxu1  ;;  %v591_v52 = vpop.permute.xlu1 %590 }
 0x146   :  { %v614_v50 = vmax.f32 %v603_v49, 0.0  ;;  %v527_v22 = vmax.f32 %v505_v16, %v516_v19  ;;  %v305_v23 = vpop.f32.mrb[36].mxu0 }
 0x147   :  { %v506_v24 = vmax.f32 %v1086_v57, %v305_v23  ;;  %v480_v25 = vpop.f32.mrb[36].mxu1  ;;  %v307_v26 = vpop.f32.mrb[37].mxu0 }
 0x148   :  { %625 = vst.msk [vmem:[%s1167_s3 + $0x28] sm:$0xff] %vm82_vm0, %v614_v50  ;;  %v604_v53 = vadd.f32 %v576_v21, %v527_v22  ;;  %v517_v27 = vmax.f32 %v1088_v58, %v480_v25  ;;  %v482_v28 = vpop.f32.mrb[37].mxu1 }
 0x14a   :  { %v615_v54 = vmax.f32 %v604_v53, 0.0  ;;  %v528_v29 = vmax.f32 %v506_v24, %v517_v27  ;;  %v310_v32 = vpop.f32.mrb[38].mxu0 }
 0x14b   :  { %v507_v30 = vmax.f32 %v1090_v61, %v310_v32  ;;  %v485_v33 = vpop.f32.mrb[38].mxu1  ;;  %v312_v35 = vpop.f32.mrb[39].mxu0 }
 0x14c   :  { %626 = vst.msk [vmem:[%s1167_s3 + $0x30] sm:$0xff] %vm82_vm0, %v615_v54  ;;  %v605_v57 = vadd.f32 %v581_v31, %v528_v29  ;;  %v518_v34 = vmax.f32 %v1092_v62, %v485_v33  ;;  %v487_v36 = vpop.f32.mrb[39].mxu1 }
 0x14e   :  { %v616_v58 = vmax.f32 %v605_v57, 0.0  ;;  %v529_v40 = vmax.f32 %v507_v30, %v518_v34  ;;  %v315_v43 = vpop.f32.mrb[40].mxu0 }
 0x14f   :  { %v508_v44 = vmax.f32 %v1094_v1, %v315_v43  ;;  %v490_v37 = vpop.f32.mrb[40].mxu1  ;;  %v317_v47 = vpop.f32.mrb[41].mxu0 }
 0x150   :  { %627 = vst.msk [vmem:[%s1167_s3 + $0x38] sm:$0xff] %vm82_vm0, %v616_v58  ;;  %v606_v61 = vadd.f32 %v586_v39, %v529_v40  ;;  %v519_v48 = vmax.f32 %v1096_v2, %v490_v37  ;;  %v492_v51 = vpop.f32.mrb[41].mxu1 }
 0x152   :  { %v617_v62 = vmax.f32 %v606_v61, 0.0  ;;  %v530_v38 = vmax.f32 %v508_v44, %v519_v48  ;;  %v320_v55 = vpop.f32.mrb[42].mxu0 }
 0x153   :  { %v509_v56 = vmax.f32 %v1098_v5, %v320_v55  ;;  %v495_v59 = vpop.f32.mrb[42].mxu1  ;;  %v322_v60 = vpop.f32.mrb[43].mxu0 }
 0x154   :  { %628 = vst.msk [vmem:[%s1167_s3 + $0x40] sm:$0xff] %vm82_vm0, %v617_v62  ;;  %v607_v1 = vadd.f32 %v591_v52, %v530_v38  ;;  %v520_v41 = vmax.f32 %v1100_v6, %v495_v59  ;;  %v497_v63 = vpop.f32.mrb[43].mxu1 }
 0x156   :  { %v618_v0 = vmax.f32 %v607_v1, 0.0  ;;  %v531_v2 = vmax.f32 %v509_v56, %v520_v41 }
 0x158   :  { %629 = vst.msk [vmem:[%s1167_s3 + $0x48] sm:$0xff] %vm82_vm0, %v618_v0  ;;  %v608_v5 = vadd.f32 %v596_v3, %v531_v2 }
 0x15a   :  { %v619_v42 = vmax.f32 %v608_v5, 0.0 }
 0x15c   :  { %630 = vst.msk [vmem:[%s1167_s3 + $0x50] sm:$0xff] %vm82_vm0, %v619_v42 }

</bundles_post_ra>
